<compile_context>
chip_gen: v6e
topology: v6e:2x2x1
jax: 0.10.0
libtpu: 0.0.40
codegen_flags: <defaults>
</compile_context>

<pallas_src>
import math
import jax
import jax.numpy as jnp
from jax.experimental import pallas as pl
from jax.experimental.pallas import tpu as pltpu


def _pelt_kernel(alpha_ref, x_ref, s_ref, noise_ref, o_ref):
    """alpha_ref: SMEM (1,) scalar-prefetch.

    x_ref/o_ref: (TB, TN) tiles.  s_ref/noise_ref: (1, TN) rows, broadcast
    over the batch tile.  The noise term is recomputed per step (free under
    the DMA) so no cross-step scratch is needed and both grid axes are
    independent ("parallel").
    """
    alpha = alpha_ref[0]

    # clip(min(x, 6), 0, alpha) == clip(x, 0, min(alpha, 6))
    eff_max = jnp.minimum(alpha, jnp.float32(6.0))
    clipped = jnp.clip(x_ref[...], jnp.float32(0.0), eff_max)

    # Batch-invariant noise term, (1, TN) broadcast over (TB, TN).
    term = alpha * jax.nn.sigmoid(s_ref[...]) * jnp.float32(0.5) * noise_ref[...]

    o_ref[...] = (clipped + term).astype(o_ref.dtype)


def _vmem_capacity_bytes():
    """Best-effort per-core VMEM capacity query; None if unavailable."""
    try:
        return int(pltpu.get_tpu_info().vmem_capacity_bytes)
    except Exception:
        return None


def pelt_forward(x, s, alpha, noise, *, out_dtype=jnp.float32):
    """PELT noisy-mode forward.

    x:     (B, C, H, W) float32
    s:     (C, H, W)    float32 (learnable parameter)
    alpha: scalar float (learnable parameter)
    noise: (C, H, W)    float32, uniform in [-1, 1), shared across the batch
    """
    B, C, H, W = x.shape
    N = C * H * W
    x2 = x.reshape(B, N)
    s2 = s.reshape(1, N)
    n2 = noise.reshape(1, N)

    # --- tile selection -----------------------------------------------------
    # Lane-dense TN target; no divisibility requirement (partial last block is
    # masked by Pallas).  Full-extent blocks are always legal for small dims.
    vmem_cap = _vmem_capacity_bytes()
    tn_target = 2048
    if vmem_cap is not None and vmem_cap <= (80 << 20):
        # v7x-class chip (64 MiB VMEM, ~3.2 TB/s HBM): ~4 MiB x-blocks better
        # amortize the fixed ~0.35-0.6 us per-grid-step overhead.
        tn_target = 4096
    TN = N if N <= tn_target else tn_target   # multiple of 128 when tiled
    TB = B if B <= 256 else 256               # multiple of 8 when tiled

    grid = (pl.cdiv(N, TN), pl.cdiv(B, TB))

    # Explicit scoped-VMEM budget: double-buffered x + out blocks plus the
    # (1, TN) s / noise rows and slack — deterministic across generations
    # (16 MiB v5e / 32 MiB v6e/v7x default scoped limits, 64 MiB v7x physical).
    block_bytes = (2 * TB * TN + 2 * TN) * 4
    vmem_limit = max(8 << 20, min(int(2.5 * block_bytes) + (2 << 20), 64 << 20))

    alpha_arr = jnp.array([alpha], dtype=jnp.float32)

    out_bytes = 2 if out_dtype == jnp.bfloat16 else 4
    cost = pl.CostEstimate(
        flops=6 * B * N,
        transcendentals=grid[1] * N,
        bytes_accessed=B * N * 4 + B * N * out_bytes + 2 * grid[1] * N * 4,
    )

    out = pl.pallas_call(
        _pelt_kernel,
        out_shape=jax.ShapeDtypeStruct((B, N), out_dtype),
        grid_spec=pltpu.PrefetchScalarGridSpec(
            num_scalar_prefetch=1,
            grid=grid,
            in_specs=[
                pl.BlockSpec((TB, TN), lambda jn, ib, alpha_r: (ib, jn)),
                pl.BlockSpec((1, TN), lambda jn, ib, alpha_r: (0, jn)),
                pl.BlockSpec((1, TN), lambda jn, ib, alpha_r: (0, jn)),
            ],
            out_specs=pl.BlockSpec((TB, TN), lambda jn, ib, alpha_r: (ib, jn)),
        ),
        compiler_params=pltpu.CompilerParams(
            # Both axes independent (term recomputed per step) -> both
            # "parallel" so megacore can shard either one.
            dimension_semantics=("parallel", "parallel"),
            vmem_limit_bytes=vmem_limit,
        ),
        cost_estimate=cost,
    )(alpha_arr, x2, s2, n2)

    return out.reshape(B, C, H, W)


if __name__ == "__main__":
    # Module config (deterministic, in-script init).
    B, C, H, W = 2, 4, 16, 16
    p_init = 4
    alpha_val = 6.0

    # s = log(2^(1-p_init) / (1 - 2^(1-p_init))) * ones(shape)
    s_val = math.log(2 ** (1 - p_init) / (1 - 2 ** (1 - p_init)))
    s = jnp.ones((C, H, W), dtype=jnp.float32) * jnp.float32(s_val)

    key = jax.random.PRNGKey(0)
    kx, kn = jax.random.split(key)
    x = jax.random.normal(kx, (B, C, H, W), dtype=jnp.float32) * 3.0
    noise = jax.random.uniform(
        kn, (C, H, W), dtype=jnp.float32, minval=-1.0, maxval=1.0
    )

    out = pelt_forward(x, s, alpha_val, noise)
    out = jax.block_until_ready(out)

    # Pure-JAX reference with the same noise draw.
    ref = (
        jnp.clip(jnp.minimum(x, 6.0), 0.0, alpha_val)
        + alpha_val * jax.nn.sigmoid(s)[None] * 0.5 * noise[None]
    )

    assert out.shape == (B, C, H, W)
    assert out.dtype == jnp.float32
    assert bool(jnp.all(jnp.isfinite(out)))
    assert bool(jnp.allclose(out, ref, atol=1e-5, rtol=1e-5))

    noise_amp = alpha_val * (1.0 / (1.0 + math.exp(-s_val))) / 2.0
    assert bool(jnp.all(out >= -noise_amp - 1e-5))
    assert bool(jnp.all(out <= alpha_val + noise_amp + 1e-5))

    print("KERNEL_OK")
</pallas_src>

<mosaic_0001>
module attributes {stable_mosaic.version = 11 : i64} {
  func.func @_pelt_kernel(%arg0: i32, %arg1: i32, %arg2: memref<1xf32, #tpu.memory_space<smem>>, %arg3: memref<2x1024xf32, #tpu.memory_space<vmem>>, %arg4: memref<1x1024xf32, #tpu.memory_space<vmem>>, %arg5: memref<1x1024xf32, #tpu.memory_space<vmem>>, %arg6: memref<2x1024xf32, #tpu.memory_space<vmem>>) attributes {dimension_semantics = [#tpu.dimension_semantics<parallel>, #tpu.dimension_semantics<parallel>], iteration_bounds = array<i64: 1, 1>, scalar_prefetch = 1 : i64, scratch_operands = 0 : i64, tpu.core_type = #tpu.core_type<tc>, window_params = [{transform_indices = @transform_0, window_bounds = array<i64: 2, 1024>}, {transform_indices = @transform_1, window_bounds = array<i64: 1, 1024>}, {transform_indices = @transform_2, window_bounds = array<i64: 1, 1024>}, {transform_indices = @transform_3, window_bounds = array<i64: 2, 1024>}]} {
    %c0 = arith.constant 0 : index
    %0 = memref.load %arg2[%c0] : memref<1xf32, #tpu.memory_space<smem>>
    %cst = arith.constant 6.000000e+00 : f32
    %1 = arith.minimumf %0, %cst : f32
    %c0_0 = arith.constant 0 : index
    %c0_1 = arith.constant 0 : index
    %2 = vector.load %arg3[%c0_0, %c0_1] : memref<2x1024xf32, #tpu.memory_space<vmem>>, vector<2x1024xf32>
    %cst_2 = arith.constant 0.000000e+00 : f32
    %3 = vector.broadcast %cst_2 : f32 to vector<2x1024xf32>
    %4 = arith.maximumf %3, %2 : vector<2x1024xf32>
    %5 = vector.broadcast %1 : f32 to vector<2x1024xf32>
    %6 = arith.minimumf %5, %4 : vector<2x1024xf32>
    %c0_3 = arith.constant 0 : index
    %c0_4 = arith.constant 0 : index
    %7 = vector.load %arg4[%c0_3, %c0_4] : memref<1x1024xf32, #tpu.memory_space<vmem>>, vector<1x1024xf32>
    %8 = arith.negf %7 : vector<1x1024xf32>
    %9 = math.exp %8 : vector<1x1024xf32>
    %cst_5 = arith.constant 1.000000e+00 : f32
    %10 = vector.broadcast %cst_5 : f32 to vector<1x1024xf32>
    %11 = arith.addf %10, %9 : vector<1x1024xf32>
    %12 = arith.divf %10, %11 : vector<1x1024xf32>
    %13 = vector.broadcast %0 : f32 to vector<1x1024xf32>
    %14 = arith.mulf %13, %12 : vector<1x1024xf32>
    %cst_6 = arith.constant 5.000000e-01 : f32
    %15 = vector.broadcast %cst_6 : f32 to vector<1x1024xf32>
    %16 = arith.mulf %14, %15 : vector<1x1024xf32>
    %c0_7 = arith.constant 0 : index
    %c0_8 = arith.constant 0 : index
    %17 = vector.load %arg5[%c0_7, %c0_8] : memref<1x1024xf32, #tpu.memory_space<vmem>>, vector<1x1024xf32>
    %18 = arith.mulf %16, %17 : vector<1x1024xf32>
    %19 = vector.broadcast %18 : vector<1x1024xf32> to vector<2x1024xf32>
    %20 = arith.addf %6, %19 : vector<2x1024xf32>
    %c0_9 = arith.constant 0 : index
    %c0_10 = arith.constant 0 : index
    %21 = vector.load %arg6[%c0_9, %c0_10] : memref<2x1024xf32, #tpu.memory_space<vmem>>, vector<2x1024xf32>
    tpu.vector_store %arg6[%c0_9, %c0_10], %20 {strides = array<i32>} : memref<2x1024xf32, #tpu.memory_space<vmem>>, vector<2x1024xf32>,
    return
  }
  func.func @transform_0(%arg0: i32, %arg1: i32, %arg2: memref<1xf32, #tpu.memory_space<smem>>) -> (i32, i32) {
    %c0_i32 = arith.constant 0 : i32
    return %arg1, %arg0 : i32, i32
  }
  func.func @transform_1(%arg0: i32, %arg1: i32, %arg2: memref<1xf32, #tpu.memory_space<smem>>) -> (i32, i32) {
    %c0_i32 = arith.constant 0 : i32
    %c0_i32_0 = arith.constant 0 : i32
    return %c0_i32, %arg0 : i32, i32
  }
  func.func @transform_2(%arg0: i32, %arg1: i32, %arg2: memref<1xf32, #tpu.memory_space<smem>>) -> (i32, i32) {
    %c0_i32 = arith.constant 0 : i32
    %c0_i32_0 = arith.constant 0 : i32
    return %c0_i32, %arg0 : i32, i32
  }
  func.func @transform_3(%arg0: i32, %arg1: i32, %arg2: memref<1xf32, #tpu.memory_space<smem>>) -> (i32, i32) {
    %c0_i32 = arith.constant 0 : i32
    return %arg1, %arg0 : i32, i32
  }
}

</mosaic_0001>

<bundles_post_ra>
// kernel: tpu_custom_call.1
= control target key start
LH: loop header
LB: loop body
LE: loop exit
PB: predicated region body
PF: predicated region fallthrough
CT: control target
= control target key end

     0   :  { %10 = vsyncpa [#allocation5], 0  ;;  %s311_s0 = inlined_call_operand.<no memory space> [shape: f32[1], index: 0, kind: input, shape index: {}]   ;;  %s312_s1 = inlined_call_operand.hbm [shape: f32[2,1024], index: 1, kind: input, shape index: {}]   ;;  %s313_s2 = inlined_call_operand.hbm [shape: f32[1,1024], index: 2, kind: input, shape index: {}]   ;;  %s314_s3 = inlined_call_operand.hbm [shape: f32[1,1024], index: 3, kind: input, shape index: {}]   ;;  %s315_s4 = inlined_call_operand.hbm [shape: f32[2,1024], index: 4, kind: output, shape index: {}]  }
   0x1   :  { %11 = vsyncpa [#allocation8], 0 }
   0x2   :  { %12 = vsyncpa [#allocation6], 0  ;;  %s259_s15 = smov [#allocation7]   ;;  %s260_s17 = smov [#allocation4]  }
   0x3   :  { %s29_s16 = sshll.u32 %s259_s15, 4  ;;  %s19_s18 = sshll.u32 %s260_s17, 4  ;;  %s30_s16 = int_to_ptr.vmem [resolvable:$true] %s29_s16  ;;  %s20_s18 = int_to_ptr.vmem [resolvable:$true] %s19_s18 }
   0x4   :  { %s181_s19 = scalar_lea.vmem %s30_s16, 128  ;;  %p186_p1 = scmp.lt.s32.totalorder %s30_s16, %s30_s16 }
   0x5   :  { %p182_p0 = scmp.ne.s32.totalorder %s30_s16, %s181_s19  ;;  %p187_p2 = scmp.lt.s32.totalorder %s181_s19, %s181_s19 }
   0x7   :  { %p188_p3 = por %p187_p2, %p186_p1 }
   0x9   :  { %p189_p4 = pnand %p188_p3, %p182_p0 }
   0xb   :  { %192 = shalt.err (!%p189_p4)
}
   0xc   :  { %32 = dma.hbm_to_vmem [thread:$0]  %s313_s2, 128, %s30_s16, [#allocation8]  }
   0xd   :  { %s201_s22 = scalar_lea.vmem %s20_s18, 256  ;;  %p206_p6 = scmp.lt.s32.totalorder %s20_s18, %s20_s18 }
   0xe   :  { %p202_p5 = scmp.ne.s32.totalorder %s20_s18, %s201_s22  ;;  %p207_p7 = scmp.lt.s32.totalorder %s201_s22, %s201_s22 }
  0x10   :  { %p208_p8 = por %p207_p7, %p206_p6 }
  0x12   :  { %p209_p9 = pnand %p208_p8, %p202_p5 }
  0x14   :  { %212 = shalt.err (!%p209_p9)
}
  0x15   :  { %22 = dma.hbm_to_vmem [thread:$0]  %s312_s1, 256, %s20_s18, [#allocation5]  }
  0x16   :  { %s261_s25 = smov [#allocation9]  }
  0x17   :  { %s39_s26 = sshll.u32 %s261_s25, 4  ;;  %s40_s26 = int_to_ptr.vmem [resolvable:$true] %s39_s26 }
  0x18   :  { %s221_s27 = scalar_lea.vmem %s40_s26, 128  ;;  %p226_p11 = scmp.lt.s32.totalorder %s40_s26, %s40_s26 }
  0x19   :  { %p222_p10 = scmp.ne.s32.totalorder %s40_s26, %s221_s27  ;;  %p227_p12 = scmp.lt.s32.totalorder %s221_s27, %s221_s27 }
  0x1b   :  { %p228_p13 = por %p227_p12, %p226_p11 }
  0x1d   :  { %p229_p0 = pnand %p228_p13, %p222_p10 }
  0x1f   :  { %232 = shalt.err (!%p229_p0)
}
  0x20   :  { %42 = dma.hbm_to_vmem [thread:$0]  %s314_s3, 128, %s40_s26, [#allocation8]  }
  0x21   :  { %253 = dma.done.wait [#allocation5], 256  }
  0x22   :  { %254 = vsyncadd [#allocation5], 4294967040 }
  0x23   :  { %255 = dma.done.wait [#allocation8], 256  }
  0x24   :  { %256 = vsyncadd [#allocation8], 4294967040  ;;  %v61_v0 = vld [vmem:[#allocation7] sm:$0xff]  ;;  %v74_v4 = vlaneseq  ;;  %v68_v5 = vstv %s311_s0  ;;  %v262_v7 = vmov 1983009808   ;;  %v71_v11 = vld [vmem:[#allocation9] sm:$0xff] }
  0x25   :  { %v162_v1 = vmul.f32 -1.442695, %v61_v0  ;;  %v109_v8 = vunpack.c.l.s4 %v262_v7  ;;  %s263_s3 = smov 6.0   ;;  %v54_v14 = vld [vmem:[#allocation4] sm:$0xff]  ;;  %v55_v19 = vld [vmem:[#allocation4 + $0x8] sm:$0xff] }
  0x26   :  { %v75_v6 = vshrl.u32 %v74_v4, 7  ;;  %s305_s6 = smin.f32 %s263_s3, %s311_s0  ;;  %v56_v25 = vmax.f32 %v54_v14, 0.0  ;;  %v57_v28 = vmax.f32 %v55_v19, 0.0  ;;  %s264_s0 = smov [#allocation10]  }
  0x27   :  { %169 = vpow2.f32 %v162_v1  ;;  %v110_v13 = vunpack.c.0.s8 %v109_v8  ;;  %v58_v26 = vstv %s305_s6  ;;  %s152_s7 = sshll.u32 %s264_s0, 4  ;;  %s153_s7 = int_to_ptr.vmem [resolvable:$true] %s152_s7 }
  0x28   :  { %v76_v12 = vsub.s32 0, %v75_v6  ;;  %v80_v16 = vsub.s32 1, %v75_v6  ;;  %v84_v17 = vsub.s32 2, %v75_v6  ;;  %v88_v18 = vsub.s32 3, %v75_v6  ;;  %s233_s8 = scalar_lea.vmem %s153_s7, 256  ;;  %p238_p2 = scmp.lt.s32.totalorder %s153_s7, %s153_s7 }
  0x29   :  { %v92_v20 = vsub.s32 4, %v75_v6  ;;  %v96_v21 = vsub.s32 5, %v75_v6  ;;  %v100_v22 = vsub.s32 6, %v75_v6  ;;  %v104_v23 = vsub.s32 7, %v75_v6  ;;  %p234_p1 = scmp.ne.s32.totalorder %s153_s7, %s233_s8  ;;  %p239_p3 = scmp.lt.s32.totalorder %s233_s8, %s233_s8 }
  0x2a   :  { %v113_v27 = vsub.s32 %v110_v13, %v75_v6  ;;  %v59_v41 = vmin.f32 %v58_v26, %v56_v25  ;;  %v60_v44 = vmin.f32 %v58_v26, %v57_v28 }
  0x2b   :  { %p240_p4 = por %p239_p3, %p238_p2 }
  0x2d   :  { %p241_p5 = pnand %p240_p4, %p234_p1 }
  0x34   :  { %v170_v2 = vpop.eup %169 }
  0x35   :  { %v65_v3 = vadd.f32 1.0, %v170_v2 }
  0x37   :  { %171 = vrcp.f32 %v65_v3 }
  0x44   :  { %v172_v9 = vpop.eup %171 }
  0x45   :  { %v69_v10 = vmul.f32 %v172_v9, %v68_v5 }
  0x47   :  { %v70_v15 = vmul.f32 0.5, %v69_v10 }
  0x49   :  { %v72_v24 = vmul.f32 %v71_v11, %v70_v15 }
  0x4b   :  { %v77_v29 = vrot.slane %v72_v24, %v76_v12  ;;  %v81_v30 = vrot.slane %v72_v24, %v80_v16  ;;  %v85_v31 = vrot.slane %v72_v24, %v84_v17  ;;  %v89_v32 = vrot.slane %v72_v24, %v88_v18 }
  0x4c   :  { %v93_v33 = vrot.slane %v72_v24, %v92_v20  ;;  %v97_v34 = vrot.slane %v72_v24, %v96_v21  ;;  %v101_v35 = vrot.slane %v72_v24, %v100_v22  ;;  %v105_v36 = vrot.slane %v72_v24, %v104_v23 }
  0x4d   :  { %v106_v37 = vcombine.low %v77_v29, %v81_v30  ;;  %v107_v38 = vcombine.low %v85_v31, %v89_v32 }
  0x4e   :  { %v123_v39 = vcombine.low %v93_v33, %v97_v34  ;;  %v124_v40 = vcombine.low %v101_v35, %v105_v36 }
  0x4f   :  { %v114_v42 = vrot.slane %v106_v37, %v113_v27  ;;  %v121_v43 = vrot.slane %v107_v38, %v113_v27 }
  0x50   :  { %v131_v45 = vrot.slane %v123_v39, %v113_v27  ;;  %v138_v46 = vrot.slane %v124_v40, %v113_v27 }
  0x51   :  { %v122_v47 = vcombine.low %v114_v42, %v121_v43 }
  0x52   :  { %v139_v48 = vcombine.low %v131_v45, %v138_v46 }
  0x53   :  { %v142_v49 = vadd.f32 %v122_v47, %v59_v41 }
  0x54   :  { %v143_v50 = vadd.f32 %v139_v48, %v60_v44 }
  0x55   :  { %144 = vst [vmem:[#allocation10] sm:$0xff] %v142_v49 }
  0x56   :  { %145 = vst [vmem:[#allocation10 + $0x8] sm:$0xff] %v143_v50 }
  0x57   :  { %244 = shalt.err (!%p241_p5)
}
  0x58   :  { %155 = dma.vmem_to_hbm [thread:$0]  %s153_s7, 256, %s315_s4, [#allocation6]  }
  0x59   :  { %257 = dma.done.wait [#allocation6], 256  }
  0x5a   :  { %258 = vsyncadd [#allocation6], 4294967040 }
  0x5b   :  { %159 = vsyncpa [#allocation5], 1 }
  0x5c   :  { %160 = vsyncpa [#allocation8], 1 }
  0x5d   :  { %161 = vsyncpa [#allocation6], 1 }

</bundles_post_ra>
